<compile_context>
chip_gen: v6e
topology: v6e:2x2x1
jax: 0.10.0
libtpu: 0.0.40
codegen_flags: <defaults>
</compile_context>

<pallas_src>
import jax
import jax.numpy as jnp
from jax.experimental import pallas as pl
from jax.experimental.pallas import tpu as pltpu

# ---------------- configuration (small, consistent with the module defaults, scaled down) ----
B, L = 2, 16                # batch, sequence length (letters per word)
LETTERS_NUMBER = 30         # letter vocabulary
N_LETTER_EMB = 32           # n_letter_embedding
D = 4                       # number of BERT layers stacked ("d")
INPUT_DIM = 16              # BERT hidden size ("input_dim" / vocab_size)
N_PROJ = 32                 # projection output
WINDOW = 5                  # conv window
N_HIDDEN = 64               # conv channels
LABELS = 8                  # labels_number
HIDDEN_DIM = N_PROJ + N_LETTER_EMB   # hidden_dim property (use_bert=True)
C = D * INPUT_DIM           # flattened BERT feature width (64)
BN_EPS = 1e-5
NEG_BIG = -1e30             # bias for padded logit lanes (f32 exp underflows to 0)

ROWS = B * L                # 32 rows seen by the kernel
H_PAD = 128                 # lane-padded conv-channel width (N_HIDDEN -> 128)
LABELS_PAD = 128            # lane-padded logits width
V_PAD = 32                  # lane-padded letter vocabulary (one-hot K dim)
IN_PAD = 128                # augmented input lanes: [x(64) | emb(32) | 1 | 0-pad]
ONE_COL = C + N_LETTER_EMB  # lane index 96 carries the constant 1 (proj-bias fold)
PAD = WINDOW // 2


def tagger_kernel(x_ref, let_ref, emb_ref, wslot_ref, base_ref, wd_ref, bd_ref, o_ref):
    """Grid-less kernel over the whole (B*L) batch.

    one-hot letter lookup (MXU) -> augmented block [x|emb|1|0] ->
    conv as WINDOW sublane-shifted masked dots -> ReLU -> dense -> log_softmax.
    """
    f32 = jnp.float32

    # --- letter embedding lookup as a one-hot matmul against the VMEM table ---
    lane_v = jax.lax.broadcasted_iota(jnp.int32, (ROWS, V_PAD), 1)
    onehot = (lane_v == let_ref[...]).astype(f32)                     # (ROWS, V_PAD)
    emb = jnp.dot(onehot, emb_ref[...], preferred_element_type=f32)   # (ROWS, N_LETTER_EMB)

    # --- augmented hidden block: [x | emb | 1 | 0...] -> (ROWS, IN_PAD) ---
    ones_blk = (jax.lax.broadcasted_iota(
        jnp.int32, (ROWS, IN_PAD - ONE_COL), 1) == 0).astype(f32)     # col 0 = 1, rest 0
    h = jnp.concatenate([x_ref[...], emb, ones_blk], axis=-1)         # (ROWS, IN_PAD)

    # --- conv ('same' padding) as WINDOW sublane-shifted dots with validity masks ---
    t_idx = jax.lax.broadcasted_iota(jnp.int32, (ROWS, 1), 0) % L     # position within sequence
    acc = jnp.zeros((ROWS, H_PAD), f32)
    for k in range(WINDOW):                                           # static, unrolled (5 slots)
        shift = k - PAD                                               # source offset
        if shift == 0:
            hk = h
        else:
            # rolled[r] = h[(r + shift) % ROWS]; wrap/cross-batch rows are masked below
            hk = pltpu.roll(h, shift=(-shift) % ROWS, axis=0)
        valid = (t_idx + shift >= 0) & (t_idx + shift < L)            # zero-padded positions
        hk = jnp.where(valid, hk, 0.0)
        acc = acc + jnp.dot(hk, wslot_ref[k], preferred_element_type=f32)

    conv = jnp.maximum(acc + base_ref[...], 0.0)                      # folded BN + b_conv, ReLU

    # --- dense to lane-padded logits (padded lanes carry -1e30 bias) + log_softmax ---
    logits = jnp.dot(conv, wd_ref[...], preferred_element_type=f32) + bd_ref[...]
    m = jnp.max(logits, axis=-1, keepdims=True)
    z = logits - m
    lse = jnp.log(jnp.sum(jnp.exp(z), axis=-1, keepdims=True))
    o_ref[...] = z - lse                                              # (ROWS, 128) lane-dense store


def tagger_forward(letters, inputs, params):
    f32 = jnp.float32

    # --- weights-only constant folding (eval-mode BN, biases, projection) ---
    scale = params["bn_gamma"] / jnp.sqrt(params["bn_var"] + BN_EPS)          # (H,)
    shift = params["bn_beta"] - params["bn_mean"] * scale                     # (H,)
    wcf = params["w_conv"] * scale[None, None, :]                             # BN folded into conv weights
    wx = jnp.einsum("cp,kph->kch", params["w_proj"], wcf[:, :N_PROJ, :])      # (W, C, H): proj folded through conv
    we = wcf[:, N_PROJ:, :]                                                   # (W, EMB, H): letter-side conv weight
    bproj = jnp.einsum("p,kph->kh", params["b_proj"], wcf[:, :N_PROJ, :])     # (W, H): proj-bias per slot
    base = params["b_conv"] * scale + shift                                   # (H,)

    # per-slot fused weight over the augmented input lanes [x | emb | 1 | 0-pad]
    w_slots = jnp.zeros((WINDOW, IN_PAD, H_PAD), f32)
    w_slots = w_slots.at[:, :C, :N_HIDDEN].set(wx)
    w_slots = w_slots.at[:, C:C + N_LETTER_EMB, :N_HIDDEN].set(we)
    w_slots = w_slots.at[:, ONE_COL, :N_HIDDEN].set(bproj)                    # applied only at valid slots

    base_pad = jnp.zeros((1, H_PAD), f32).at[0, :N_HIDDEN].set(base)
    emb_pad = jnp.zeros((V_PAD, N_LETTER_EMB), f32).at[:LETTERS_NUMBER, :].set(params["letter_embedding"])
    w_dense_pad = jnp.zeros((H_PAD, LABELS_PAD), f32).at[:N_HIDDEN, :LABELS].set(params["w_dense"])
    b_dense_pad = jnp.full((1, LABELS_PAD), NEG_BIG, f32).at[0, :LABELS].set(params["b_dense"])

    # --- data: only flat views, no pad / im2col / gather glue on the XLA side ---
    x2d = inputs.reshape(ROWS, C).astype(f32)
    let2d = letters.reshape(ROWS, 1).astype(jnp.int32)

    vmem = pl.BlockSpec(memory_space=pltpu.MemorySpace.VMEM)
    out = pl.pallas_call(
        tagger_kernel,
        out_shape=jax.ShapeDtypeStruct((ROWS, LABELS_PAD), jnp.float32),
        in_specs=[vmem] * 7,
        out_specs=vmem,
    )(x2d, let2d, emb_pad, w_slots, base_pad, w_dense_pad, b_dense_pad)

    return out[:, :LABELS].reshape(B, L, LABELS)


def reference_forward(letters, inputs, params):
    """Pure-JAX reference of the unfused forward pass (sanity check)."""
    le = params["letter_embedding"][letters]
    x = inputs.reshape(B, L, C)
    proj = x @ params["w_proj"] + params["b_proj"]
    h = jnp.concatenate([proj, le], axis=-1)
    hp = jnp.pad(h, ((0, 0), (PAD, PAD), (0, 0)))
    conv = sum(jnp.einsum("blc,cd->bld", hp[:, k:k + L, :], params["w_conv"][k])
               for k in range(WINDOW)) + params["b_conv"]
    scale = params["bn_gamma"] / jnp.sqrt(params["bn_var"] + BN_EPS)
    shift = params["bn_beta"] - params["bn_mean"] * scale
    conv = jnp.maximum(conv * scale + shift, 0.0)
    logits = conv @ params["w_dense"] + params["b_dense"]
    return jax.nn.log_softmax(logits, axis=-1)


def init_params(key):
    ks = jax.random.split(key, 8)
    s = 0.05
    return {
        "letter_embedding": s * jax.random.normal(ks[0], (LETTERS_NUMBER, N_LETTER_EMB), jnp.float32),
        "w_proj":  s * jax.random.normal(ks[1], (C, N_PROJ), jnp.float32),
        "b_proj":  s * jax.random.normal(ks[2], (N_PROJ,), jnp.float32),
        "w_conv":  s * jax.random.normal(ks[3], (WINDOW, HIDDEN_DIM, N_HIDDEN), jnp.float32),
        "b_conv":  s * jax.random.normal(ks[4], (N_HIDDEN,), jnp.float32),
        "bn_gamma": 1.0 + s * jax.random.normal(ks[5], (N_HIDDEN,), jnp.float32),
        "bn_beta":  s * jax.random.normal(ks[6], (N_HIDDEN,), jnp.float32),
        "bn_mean":  jnp.zeros((N_HIDDEN,), jnp.float32),
        "bn_var":   jnp.ones((N_HIDDEN,), jnp.float32),
        "w_dense": s * jax.random.normal(ks[7], (N_HIDDEN, LABELS), jnp.float32),
        "b_dense": jnp.zeros((LABELS,), jnp.float32),
    }


if __name__ == "__main__":
    key = jax.random.PRNGKey(0)
    k_let, k_inp, k_par = jax.random.split(key, 3)

    letters = jax.random.randint(k_let, (B, L), 0, LETTERS_NUMBER, dtype=jnp.int32)
    inputs = jax.random.normal(k_inp, (B, L, D, INPUT_DIM), jnp.float32)
    params = init_params(k_par)

    fwd = jax.jit(tagger_forward)
    out = jax.block_until_ready(fwd(letters, inputs, params))
    ref = jax.block_until_ready(reference_forward(letters, inputs, params))

    assert out.shape == (B, L, LABELS)
    assert jnp.all(jnp.isfinite(out)), "non-finite output"
    assert jnp.allclose(out, ref, rtol=1e-4, atol=1e-4), "mismatch vs JAX reference"
    print("KERNEL_OK")
</pallas_src>

<mosaic_0001>
module attributes {stable_mosaic.version = 11 : i64} {
  func.func @tagger_kernel(%arg0: memref<32x64xf32, #tpu.memory_space<vmem>>, %arg1: memref<32x1xi32, #tpu.memory_space<vmem>>, %arg2: memref<32x32xf32, #tpu.memory_space<vmem>>, %arg3: memref<5x128x128xf32, #tpu.memory_space<vmem>>, %arg4: memref<1x128xf32, #tpu.memory_space<vmem>>, %arg5: memref<128x128xf32, #tpu.memory_space<vmem>>, %arg6: memref<1x128xf32, #tpu.memory_space<vmem>>, %arg7: memref<32x128xf32, #tpu.memory_space<vmem>>) attributes {dimension_semantics = [], scalar_prefetch = 0 : i64, scratch_operands = 0 : i64, tpu.core_type = #tpu.core_type<tc>} {
    %0 = tpu.iota {dimensions = array<i32: 1>} : vector<32x32xi32>
    %c0 = arith.constant 0 : index
    %c0_0 = arith.constant 0 : index
    %1 = vector.load %arg1[%c0, %c0_0] : memref<32x1xi32, #tpu.memory_space<vmem>>, vector<32x1xi32>
    %2 = vector.broadcast %1 : vector<32x1xi32> to vector<32x32xi32>
    %3 = arith.cmpi eq, %0, %2 : vector<32x32xi32>
    %4 = arith.extui %3 : vector<32x32xi1> to vector<32x32xi32>
    %5 = arith.sitofp %4 : vector<32x32xi32> to vector<32x32xf32>
    %c0_1 = arith.constant 0 : index
    %c0_2 = arith.constant 0 : index
    %6 = vector.load %arg2[%c0_1, %c0_2] : memref<32x32xf32, #tpu.memory_space<vmem>>, vector<32x32xf32>
    %cst = arith.constant dense<0.000000e+00> : vector<32x32xf32>
    %7 = tpu.matmul %5, %6, %cst {dimension_numbers = #tpu.dot_dimension_numbers<[1], [0], [0], [1], [0, 0, 1, 1], [], []>} : vector<32x32xf32>, vector<32x32xf32>, vector<32x32xf32> -> vector<32x32xf32>
    %8 = tpu.iota {dimensions = array<i32: 1>} : vector<32x32xi32>
    %c0_i32 = arith.constant 0 : i32
    %9 = vector.broadcast %c0_i32 : i32 to vector<32x32xi32>
    %10 = arith.cmpi eq, %8, %9 : vector<32x32xi32>
    %11 = arith.extui %10 : vector<32x32xi1> to vector<32x32xi32>
    %12 = arith.sitofp %11 : vector<32x32xi32> to vector<32x32xf32>
    %c0_3 = arith.constant 0 : index
    %c0_4 = arith.constant 0 : index
    %13 = vector.load %arg0[%c0_3, %c0_4] : memref<32x64xf32, #tpu.memory_space<vmem>>, vector<32x64xf32>
    %14 = tpu.concatenate %13, %7, %12 in 1 : vector<32x64xf32>, vector<32x32xf32>, vector<32x32xf32> -> vector<32x128xf32>
    %15 = tpu.iota {dimensions = array<i32: 0>} : vector<32x1xi32>
    %c16_i32 = arith.constant 16 : i32
    %c0_i32_5 = arith.constant 0 : i32
    %16 = arith.cmpi eq, %c16_i32, %c0_i32_5 : i32
    %c1_i32 = arith.constant 1 : i32
    %17 = arith.select %16, %c1_i32, %c16_i32 : i32
    %18 = vector.broadcast %17 : i32 to vector<32x1xi32>
    %19 = arith.remsi %15, %18 : vector<32x1xi32>
    %c0_i32_6 = arith.constant 0 : i32
    %20 = vector.broadcast %c0_i32_6 : i32 to vector<32x1xi32>
    %21 = arith.cmpi ne, %19, %20 : vector<32x1xi32>
    %c0_i32_7 = arith.constant 0 : i32
    %22 = vector.broadcast %c0_i32_7 : i32 to vector<32x1xi32>
    %23 = arith.cmpi slt, %19, %22 : vector<32x1xi32>
    %c0_i32_8 = arith.constant 0 : i32
    %24 = arith.cmpi slt, %17, %c0_i32_8 : i32
    %25 = vector.broadcast %24 : i1 to vector<32x1xi1>
    %26 = vector.broadcast %25 : vector<32x1xi1> to vector<32x1xi1>
    %27 = arith.xori %23, %26 : vector<32x1xi1>
    %28 = arith.andi %27, %21 : vector<32x1xi1>
    %29 = vector.broadcast %17 : i32 to vector<32x1xi32>
    %30 = arith.addi %19, %29 : vector<32x1xi32>
    %31 = arith.select %28, %30, %19 : vector<32x1xi1>, vector<32x1xi32>
    %cst_9 = arith.constant 0.000000e+00 : f32
    %32 = vector.broadcast %cst_9 : f32 to vector<32x128xf32>
    %c2_i32 = arith.constant 2 : i32
    %33 = tpu.dynamic_rotate %14 by %c2_i32 dim 0 : vector<32x128xf32>, i32 -> vector<32x128xf32>
    %c-2_i32 = arith.constant -2 : i32
    %34 = vector.broadcast %c-2_i32 : i32 to vector<32x1xi32>
    %35 = arith.addi %31, %34 : vector<32x1xi32>
    %c0_i32_10 = arith.constant 0 : i32
    %36 = vector.broadcast %c0_i32_10 : i32 to vector<32x1xi32>
    %37 = arith.cmpi sge, %35, %36 : vector<32x1xi32>
    %c-2_i32_11 = arith.constant -2 : i32
    %38 = vector.broadcast %c-2_i32_11 : i32 to vector<32x1xi32>
    %39 = arith.addi %31, %38 : vector<32x1xi32>
    %c16_i32_12 = arith.constant 16 : i32
    %40 = vector.broadcast %c16_i32_12 : i32 to vector<32x1xi32>
    %41 = arith.cmpi slt, %39, %40 : vector<32x1xi32>
    %42 = arith.andi %37, %41 : vector<32x1xi1>
    %cst_13 = arith.constant 0.000000e+00 : f32
    %43 = vector.shape_cast %42 : vector<32x1xi1> to vector<32x1xi1>
    %44 = vector.broadcast %43 : vector<32x1xi1> to vector<32x128xi1>
    %45 = vector.broadcast %cst_13 : f32 to vector<32x128xf32>
    %46 = arith.select %44, %33, %45 : vector<32x128xi1>, vector<32x128xf32>
    %c0_14 = arith.constant 0 : index
    %c0_15 = arith.constant 0 : index
    %c0_16 = arith.constant 0 : index
    %47 = vector.load %arg3[%c0_14, %c0_15, %c0_16] : memref<5x128x128xf32, #tpu.memory_space<vmem>>, vector<1x128x128xf32>
    %48 = vector.shape_cast %47 : vector<1x128x128xf32> to vector<128x128xf32>
    %cst_17 = arith.constant dense<0.000000e+00> : vector<32x128xf32>
    %49 = tpu.matmul %46, %48, %cst_17 {dimension_numbers = #tpu.dot_dimension_numbers<[1], [0], [0], [1], [0, 0, 1, 1], [], []>} : vector<32x128xf32>, vector<128x128xf32>, vector<32x128xf32> -> vector<32x128xf32>
    %50 = arith.addf %32, %49 : vector<32x128xf32>
    %c1_i32_18 = arith.constant 1 : i32
    %51 = tpu.dynamic_rotate %14 by %c1_i32_18 dim 0 : vector<32x128xf32>, i32 -> vector<32x128xf32>
    %c-1_i32 = arith.constant -1 : i32
    %52 = vector.broadcast %c-1_i32 : i32 to vector<32x1xi32>
    %53 = arith.addi %31, %52 : vector<32x1xi32>
    %c0_i32_19 = arith.constant 0 : i32
    %54 = vector.broadcast %c0_i32_19 : i32 to vector<32x1xi32>
    %55 = arith.cmpi sge, %53, %54 : vector<32x1xi32>
    %c-1_i32_20 = arith.constant -1 : i32
    %56 = vector.broadcast %c-1_i32_20 : i32 to vector<32x1xi32>
    %57 = arith.addi %31, %56 : vector<32x1xi32>
    %c16_i32_21 = arith.constant 16 : i32
    %58 = vector.broadcast %c16_i32_21 : i32 to vector<32x1xi32>
    %59 = arith.cmpi slt, %57, %58 : vector<32x1xi32>
    %60 = arith.andi %55, %59 : vector<32x1xi1>
    %cst_22 = arith.constant 0.000000e+00 : f32
    %61 = vector.shape_cast %60 : vector<32x1xi1> to vector<32x1xi1>
    %62 = vector.broadcast %61 : vector<32x1xi1> to vector<32x128xi1>
    %63 = vector.broadcast %cst_22 : f32 to vector<32x128xf32>
    %64 = arith.select %62, %51, %63 : vector<32x128xi1>, vector<32x128xf32>
    %c1 = arith.constant 1 : index
    %c0_23 = arith.constant 0 : index
    %c0_24 = arith.constant 0 : index
    %65 = vector.load %arg3[%c1, %c0_23, %c0_24] : memref<5x128x128xf32, #tpu.memory_space<vmem>>, vector<1x128x128xf32>
    %66 = vector.shape_cast %65 : vector<1x128x128xf32> to vector<128x128xf32>
    %cst_25 = arith.constant dense<0.000000e+00> : vector<32x128xf32>
    %67 = tpu.matmul %64, %66, %cst_25 {dimension_numbers = #tpu.dot_dimension_numbers<[1], [0], [0], [1], [0, 0, 1, 1], [], []>} : vector<32x128xf32>, vector<128x128xf32>, vector<32x128xf32> -> vector<32x128xf32>
    %68 = arith.addf %50, %67 : vector<32x128xf32>
    %c0_i32_26 = arith.constant 0 : i32
    %69 = vector.broadcast %c0_i32_26 : i32 to vector<32x1xi32>
    %70 = arith.addi %31, %69 : vector<32x1xi32>
    %c0_i32_27 = arith.constant 0 : i32
    %71 = vector.broadcast %c0_i32_27 : i32 to vector<32x1xi32>
    %72 = arith.cmpi sge, %70, %71 : vector<32x1xi32>
    %c0_i32_28 = arith.constant 0 : i32
    %73 = vector.broadcast %c0_i32_28 : i32 to vector<32x1xi32>
    %74 = arith.addi %31, %73 : vector<32x1xi32>
    %c16_i32_29 = arith.constant 16 : i32
    %75 = vector.broadcast %c16_i32_29 : i32 to vector<32x1xi32>
    %76 = arith.cmpi slt, %74, %75 : vector<32x1xi32>
    %77 = arith.andi %72, %76 : vector<32x1xi1>
    %cst_30 = arith.constant 0.000000e+00 : f32
    %78 = vector.shape_cast %77 : vector<32x1xi1> to vector<32x1xi1>
    %79 = vector.broadcast %78 : vector<32x1xi1> to vector<32x128xi1>
    %80 = vector.broadcast %cst_30 : f32 to vector<32x128xf32>
    %81 = arith.select %79, %14, %80 : vector<32x128xi1>, vector<32x128xf32>
    %c2 = arith.constant 2 : index
    %c0_31 = arith.constant 0 : index
    %c0_32 = arith.constant 0 : index
    %82 = vector.load %arg3[%c2, %c0_31, %c0_32] : memref<5x128x128xf32, #tpu.memory_space<vmem>>, vector<1x128x128xf32>
    %83 = vector.shape_cast %82 : vector<1x128x128xf32> to vector<128x128xf32>
    %cst_33 = arith.constant dense<0.000000e+00> : vector<32x128xf32>
    %84 = tpu.matmul %81, %83, %cst_33 {dimension_numbers = #tpu.dot_dimension_numbers<[1], [0], [0], [1], [0, 0, 1, 1], [], []>} : vector<32x128xf32>, vector<128x128xf32>, vector<32x128xf32> -> vector<32x128xf32>
    %85 = arith.addf %68, %84 : vector<32x128xf32>
    %c31_i32 = arith.constant 31 : i32
    %86 = tpu.dynamic_rotate %14 by %c31_i32 dim 0 : vector<32x128xf32>, i32 -> vector<32x128xf32>
    %c1_i32_34 = arith.constant 1 : i32
    %87 = vector.broadcast %c1_i32_34 : i32 to vector<32x1xi32>
    %88 = arith.addi %31, %87 : vector<32x1xi32>
    %c0_i32_35 = arith.constant 0 : i32
    %89 = vector.broadcast %c0_i32_35 : i32 to vector<32x1xi32>
    %90 = arith.cmpi sge, %88, %89 : vector<32x1xi32>
    %c1_i32_36 = arith.constant 1 : i32
    %91 = vector.broadcast %c1_i32_36 : i32 to vector<32x1xi32>
    %92 = arith.addi %31, %91 : vector<32x1xi32>
    %c16_i32_37 = arith.constant 16 : i32
    %93 = vector.broadcast %c16_i32_37 : i32 to vector<32x1xi32>
    %94 = arith.cmpi slt, %92, %93 : vector<32x1xi32>
    %95 = arith.andi %90, %94 : vector<32x1xi1>
    %cst_38 = arith.constant 0.000000e+00 : f32
    %96 = vector.shape_cast %95 : vector<32x1xi1> to vector<32x1xi1>
    %97 = vector.broadcast %96 : vector<32x1xi1> to vector<32x128xi1>
    %98 = vector.broadcast %cst_38 : f32 to vector<32x128xf32>
    %99 = arith.select %97, %86, %98 : vector<32x128xi1>, vector<32x128xf32>
    %c3 = arith.constant 3 : index
    %c0_39 = arith.constant 0 : index
    %c0_40 = arith.constant 0 : index
    %100 = vector.load %arg3[%c3, %c0_39, %c0_40] : memref<5x128x128xf32, #tpu.memory_space<vmem>>, vector<1x128x128xf32>
    %101 = vector.shape_cast %100 : vector<1x128x128xf32> to vector<128x128xf32>
    %cst_41 = arith.constant dense<0.000000e+00> : vector<32x128xf32>
    %102 = tpu.matmul %99, %101, %cst_41 {dimension_numbers = #tpu.dot_dimension_numbers<[1], [0], [0], [1], [0, 0, 1, 1], [], []>} : vector<32x128xf32>, vector<128x128xf32>, vector<32x128xf32> -> vector<32x128xf32>
    %103 = arith.addf %85, %102 : vector<32x128xf32>
    %c30_i32 = arith.constant 30 : i32
    %104 = tpu.dynamic_rotate %14 by %c30_i32 dim 0 : vector<32x128xf32>, i32 -> vector<32x128xf32>
    %c2_i32_42 = arith.constant 2 : i32
    %105 = vector.broadcast %c2_i32_42 : i32 to vector<32x1xi32>
    %106 = arith.addi %31, %105 : vector<32x1xi32>
    %c0_i32_43 = arith.constant 0 : i32
    %107 = vector.broadcast %c0_i32_43 : i32 to vector<32x1xi32>
    %108 = arith.cmpi sge, %106, %107 : vector<32x1xi32>
    %c2_i32_44 = arith.constant 2 : i32
    %109 = vector.broadcast %c2_i32_44 : i32 to vector<32x1xi32>
    %110 = arith.addi %31, %109 : vector<32x1xi32>
    %c16_i32_45 = arith.constant 16 : i32
    %111 = vector.broadcast %c16_i32_45 : i32 to vector<32x1xi32>
    %112 = arith.cmpi slt, %110, %111 : vector<32x1xi32>
    %113 = arith.andi %108, %112 : vector<32x1xi1>
    %cst_46 = arith.constant 0.000000e+00 : f32
    %114 = vector.shape_cast %113 : vector<32x1xi1> to vector<32x1xi1>
    %115 = vector.broadcast %114 : vector<32x1xi1> to vector<32x128xi1>
    %116 = vector.broadcast %cst_46 : f32 to vector<32x128xf32>
    %117 = arith.select %115, %104, %116 : vector<32x128xi1>, vector<32x128xf32>
    %c4 = arith.constant 4 : index
    %c0_47 = arith.constant 0 : index
    %c0_48 = arith.constant 0 : index
    %118 = vector.load %arg3[%c4, %c0_47, %c0_48] : memref<5x128x128xf32, #tpu.memory_space<vmem>>, vector<1x128x128xf32>
    %119 = vector.shape_cast %118 : vector<1x128x128xf32> to vector<128x128xf32>
    %cst_49 = arith.constant dense<0.000000e+00> : vector<32x128xf32>
    %120 = tpu.matmul %117, %119, %cst_49 {dimension_numbers = #tpu.dot_dimension_numbers<[1], [0], [0], [1], [0, 0, 1, 1], [], []>} : vector<32x128xf32>, vector<128x128xf32>, vector<32x128xf32> -> vector<32x128xf32>
    %121 = arith.addf %103, %120 : vector<32x128xf32>
    %c0_50 = arith.constant 0 : index
    %c0_51 = arith.constant 0 : index
    %122 = vector.load %arg4[%c0_50, %c0_51] : memref<1x128xf32, #tpu.memory_space<vmem>>, vector<1x128xf32>
    %123 = vector.broadcast %122 : vector<1x128xf32> to vector<32x128xf32>
    %124 = arith.addf %121, %123 : vector<32x128xf32>
    %cst_52 = arith.constant 0.000000e+00 : f32
    %125 = vector.broadcast %cst_52 : f32 to vector<32x128xf32>
    %126 = arith.maximumf %124, %125 : vector<32x128xf32>
    %c0_53 = arith.constant 0 : index
    %c0_54 = arith.constant 0 : index
    %127 = vector.load %arg5[%c0_53, %c0_54] : memref<128x128xf32, #tpu.memory_space<vmem>>, vector<128x128xf32>
    %cst_55 = arith.constant dense<0.000000e+00> : vector<32x128xf32>
    %128 = tpu.matmul %126, %127, %cst_55 {dimension_numbers = #tpu.dot_dimension_numbers<[1], [0], [0], [1], [0, 0, 1, 1], [], []>} : vector<32x128xf32>, vector<128x128xf32>, vector<32x128xf32> -> vector<32x128xf32>
    %c0_56 = arith.constant 0 : index
    %c0_57 = arith.constant 0 : index
    %129 = vector.load %arg6[%c0_56, %c0_57] : memref<1x128xf32, #tpu.memory_space<vmem>>, vector<1x128xf32>
    %130 = vector.broadcast %129 : vector<1x128xf32> to vector<32x128xf32>
    %131 = arith.addf %128, %130 : vector<32x128xf32>
    %cst_58 = arith.constant dense<0xFF800000> : vector<32xf32>
    %132 = vector.multi_reduction <maximumf>, %131, %cst_58 [1] : vector<32x128xf32> to vector<32xf32>
    %133 = vector.shape_cast %132 : vector<32xf32> to vector<32x1xf32>
    %134 = vector.broadcast %133 : vector<32x1xf32> to vector<32x128xf32>
    %135 = arith.subf %131, %134 : vector<32x128xf32>
    %136 = math.exp %135 : vector<32x128xf32>
    %cst_59 = arith.constant dense<0.000000e+00> : vector<32xf32>
    %137 = vector.multi_reduction <add>, %136, %cst_59 [1] : vector<32x128xf32> to vector<32xf32>
    %138 = vector.shape_cast %137 : vector<32xf32> to vector<32x1xf32>
    %139 = math.log %138 : vector<32x1xf32>
    %140 = vector.broadcast %139 : vector<32x1xf32> to vector<32x128xf32>
    %141 = arith.subf %135, %140 : vector<32x128xf32>
    %c0_60 = arith.constant 0 : index
    %c0_61 = arith.constant 0 : index
    %142 = vector.load %arg7[%c0_60, %c0_61] : memref<32x128xf32, #tpu.memory_space<vmem>>, vector<32x128xf32>
    tpu.vector_store %arg7[%c0_60, %c0_61], %141 {strides = array<i32>} : memref<32x128xf32, #tpu.memory_space<vmem>>, vector<32x128xf32>,
    return
  }
}

</mosaic_0001>

<bundles_post_ra>
// kernel: tagger_forward.1
= control target key start
LH: loop header
LB: loop body
LE: loop exit
PB: predicated region body
PF: predicated region fallthrough
CT: control target
= control target key end

     0   :  { %v1587_v0 = vmov 0   ;;  %v26_v9 = vlaneseq  ;;  %vm60_vm0 = vcmask 261120   ;;  %v1588_v13 = vmov 0.0   ;;  %s1589_s10 = smov 64   ;;  %s1590_s11 = smov 96   ;;  %s2115_s1 = inlined_call_operand.vmem [shape: s32[32,1], index: 1, kind: input, shape index: {}]   ;;  %s2116_s2 = inlined_call_operand.vmem [shape: f32[32,32], index: 2, kind: input, shape index: {}]   ;;  %s2117_s3 = inlined_call_operand.vmem [shape: f32[5,128,128], index: 3, kind: input, shape index: {}]   ;;  %s2118_s0 = inlined_call_operand.vmem [shape: f32[32,64], index: 0, kind: input, shape index: {}]   ;;  %s2119_s5 = inlined_call_operand.vmem [shape: f32[128,128], index: 5, kind: input, shape index: {}]   ;;  %s2120_s4 = inlined_call_operand.vmem [shape: f32[1,128], index: 4, kind: input, shape index: {}]   ;;  %s2121_s6 = inlined_call_operand.vmem [shape: f32[1,128], index: 6, kind: input, shape index: {}]   ;;  %s2122_s7 = inlined_call_operand.vmem [shape: f32[32,128], index: 7, kind: output, shape index: {}]  }
   0x1   :  { %1570 = vset.pattern.permute.xlu1 %v1587_v0  ;;  %1569 = vset.pattern.permute.xlu0 %v1587_v0  ;;  %v30_v1 = vld [vmem:[%s2115_s1 + $0x10] sm:$0xff]  ;;  %v28_v2 = vld [vmem:[%s2115_s1] sm:$0xff]  ;;  %v59_v3 = vld [vmem:[%s2116_s2 + $0x18] sm:$0xff]  ;;  %vm185_vm6 = vcmask 523264   ;;  %vm190_vm7 = vcmask 785408  }
   0x2   :  { %39 = vperm.xlu1 %1570, %v30_v1   ;;  %33 = vperm.xlu0 %1569, %v28_v2   ;;  %v58_v4 = vld [vmem:[%s2116_s2 + $0x10] sm:$0xff]  ;;  %v31_v5 = vld [vmem:[%s2115_s1 + $0x18] sm:$0xff]  ;;  %v29_v6 = vld [vmem:[%s2115_s1 + $0x8] sm:$0xff]  ;;  %v1656_v10 = vand.u32 127, %v26_v9  ;;  %v1777_v59 = vshrl.u32 %v26_v9, 7 }
   0x3   :  { %1323 = vmatprep.subr.mxu0 %v59_v3  ;;  %v57_v7 = vld [vmem:[%s2116_s2 + $0x8] sm:$0xff]  ;;  %v56_v8 = vld [vmem:[%s2116_s2] sm:$0xff]  ;;  %v1136_v20 = vld [vmem:[%s2117_s3 + $0xf8] sm:$0xff] }
   0x4   :  { %1324 = vmatpush3.msra.mxu0 %v59_v3  ;;  %v300_v21 = vld [vmem:[%s2117_s3 + $0x78] sm:$0xff]  ;;  %v1135_v22 = vld [vmem:[%s2117_s3 + $0xf0] sm:$0xff]  ;;  %1337 = vmatprep.subr.mxu1 %v1136_v20  ;;  %v1134_v24 = vld [vmem:[%s2117_s3 + $0xe8] sm:$0xff]  ;;  %vm158_vm5 = vcmp.eq.s32.totalorder %v1656_v10, 0  ;;  %v204_v60 = vand.u32 15, %v1777_v59  ;;  %v198_v61 = vadd.s32 16, %v1777_v59 }
   0x5   :  { %1325 = vmatprep.subr.mxu0 %v58_v4  ;;  %v299_v23 = vld [vmem:[%s2117_s3 + $0x70] sm:$0xff]  ;;  %1338 = vmatpush3.msra.mxu1 %v1136_v20  ;;  %v298_v25 = vld [vmem:[%s2117_s3 + $0x68] sm:$0xff]  ;;  %v1133_v26 = vld [vmem:[%s2117_s3 + $0xe0] sm:$0xff]  ;;  %v1120_v57 = vsel %vm158_vm5, 1.0, %v1588_v13  ;;  %vm305_vm8 = vcmp.lt.s32.totalorder %v1777_v59, 1  ;;  %vm252_vm10 = vcmp.lt.s32.totalorder %v1777_v59, 2 }
   0x6   :  { %42 = vperm.xlu1 %1570, %v31_v5   ;;  %36 = vperm.xlu0 %1569, %v29_v6   ;;  %v297_v27 = vld [vmem:[%s2117_s3 + $0x60] sm:$0xff]  ;;  %v1132_v28 = vld [vmem:[%s2117_s3 + $0xd8] sm:$0xff]  ;;  %v1131_v30 = vld [vmem:[%s2117_s3 + $0xd0] sm:$0xff]  ;;  %v310_v63 = vadd.s32 4294967295, %v204_v60  ;;  %v257_v2 = vadd.s32 4294967294, %v204_v60  ;;  %v218_v3 = vand.u32 15, %v198_v61 }
   0x7   :  { %1326 = vmatpush3.msra.mxu0 %v58_v4  ;;  %1339 = vmatprep.subr.mxu1 %v1135_v22  ;;  %v296_v29 = vld [vmem:[%s2117_s3 + $0x58] sm:$0xff]  ;;  %v295_v31 = vld [vmem:[%s2117_s3 + $0x50] sm:$0xff]  ;;  %v1130_v32 = vld [vmem:[%s2117_s3 + $0xc8] sm:$0xff]  ;;  %vm802_vm14 = vcmp.lt.s32.totalorder %v1777_v59, 6  ;;  %vm659_vm15 = vcmp.lt.s32.totalorder %v1777_v59, 7 }
   0x8   :  { %1327 = vmatprep.subr.mxu0 %v57_v7  ;;  %1340 = vmatpush3.msra.mxu1 %v1135_v22  ;;  %v294_v33 = vld [vmem:[%s2117_s3 + $0x48] sm:$0xff]  ;;  %v1129_v34 = vld [vmem:[%s2117_s3 + $0xc0] sm:$0xff]  ;;  %v1128_v36 = vld [vmem:[%s2117_s3 + $0xb8] sm:$0xff]  ;;  %vm314_vm9 = vcmp.ge.s32.totalorder %v310_v63, 0  ;;  %vm261_vm11 = vcmp.ge.s32.totalorder %v257_v2, 0 }
   0x9   :  { %1328 = vmatpush3.msra.mxu0 %v57_v7  ;;  %1341 = vmatprep.subr.mxu1 %v1134_v24  ;;  %v293_v35 = vld [vmem:[%s2117_s3 + $0x40] sm:$0xff]  ;;  %v292_v37 = vld [vmem:[%s2117_s3 + $0x38] sm:$0xff]  ;;  %v1127_v38 = vld [vmem:[%s2117_s3 + $0xb0] sm:$0xff] }
   0xa   :  { %1329 = vmatprep.subr.mxu0 %v56_v8  ;;  %1342 = vmatpush3.msra.mxu1 %v1134_v24  ;;  %v291_v39 = vld [vmem:[%s2117_s3 + $0x30] sm:$0xff]  ;;  %v1126_v40 = vld [vmem:[%s2117_s3 + $0xa8] sm:$0xff]  ;;  %v1125_v42 = vld [vmem:[%s2117_s3 + $0xa0] sm:$0xff] }
   0xb   :  { %1330 = vmatpush3.msra.mxu0 %v56_v8  ;;  %1343 = vmatprep.subr.mxu1 %v1133_v26  ;;  %v290_v41 = vld [vmem:[%s2117_s3 + $0x28] sm:$0xff]  ;;  %v289_v43 = vld [vmem:[%s2117_s3 + $0x20] sm:$0xff]  ;;  %v1124_v44 = vld [vmem:[%s2117_s3 + $0x98] sm:$0xff] }
   0xc   :  { %1375 = vmatprep.subr.mxu0 %v300_v21  ;;  %1344 = vmatpush3.msra.mxu1 %v1133_v26  ;;  %v288_v45 = vld [vmem:[%s2117_s3 + $0x18] sm:$0xff]  ;;  %v1123_v46 = vld [vmem:[%s2117_s3 + $0x90] sm:$0xff]  ;;  %v1122_v48 = vld [vmem:[%s2117_s3 + $0x88] sm:$0xff] }
   0xd   :  { %1345 = vmatprep.subr.mxu1 %v1132_v28  ;;  %v287_v47 = vld [vmem:[%s2117_s3 + $0x10] sm:$0xff]  ;;  %v286_v49 = vld [vmem:[%s2117_s3 + $0x8] sm:$0xff]  ;;  %v1121_v50 = vld [vmem:[%s2117_s3 + $0x80] sm:$0xff] }
   0xe   :  { %1346 = vmatpush3.msra.mxu1 %v1132_v28  ;;  %v285_v51 = vld [vmem:[%s2117_s3] sm:$0xff]  ;;  %v1765_v52 = vld [vmem:[%s2117_s3 + $0x178] sm:$0xff]  ;;  %v162_v1 = vld [vmem:[%s2118_s0 + $0x8] sm:$0xff] }
   0xf   :  { %1347 = vmatprep.subr.mxu1 %v1131_v30  ;;  %v1770_v53 = vld [vmem:[%s2117_s3 + $0x1f8] sm:$0xff]  ;;  %v161_v4 = vld [vmem:[%s2118_s0] sm:$0xff]  ;;  %v1147_v63 = vld [vmem:[%s2117_s3 + $0x130] sm:$0xff] }
  0x10   :  { %1348 = vmatpush3.msra.mxu1 %v1131_v30  ;;  %v164_v5 = vld [vmem:[%s2118_s0 + $0x18] sm:$0xff]  ;;  %v1155_v30 = vld [vmem:[%s2117_s3 + $0x170] sm:$0xff]  ;;  %v1165_v60 = vld [vmem:[%s2117_s3 + $0x1c0] sm:$0xff] }
  0x11   :  { %1349 = vmatprep.subr.mxu1 %v1130_v32  ;;  %v1148_v61 = vld [vmem:[%s2117_s3 + $0x138] sm:$0xff]  ;;  %v1162_v2 = vld [vmem:[%s2117_s3 + $0x1a8] sm:$0xff] }
  0x12   :  { %1350 = vmatpush3.msra.mxu1 %v1130_v32 }
  0x13   :  { %1351 = vmatprep.subr.mxu1 %v1129_v34 }
  0x14   :  { %1352 = vmatpush3.msra.mxu1 %v1129_v34 }
  0x15   :  { %1353 = vmatprep.subr.mxu1 %v1128_v36 }
  0x16   :  { %1354 = vmatpush3.msra.mxu1 %v1128_v36 }
  0x17   :  { %1355 = vmatprep.subr.mxu1 %v1127_v38 }
  0x18   :  { %1356 = vmatpush3.msra.mxu1 %v1127_v38 }
  0x19   :  { %1357 = vmatprep.subr.mxu1 %v1126_v40 }
  0x1a   :  { %1358 = vmatpush3.msra.mxu1 %v1126_v40  ;;  %v1170_v40 = vld [vmem:[%s2117_s3 + $0x1e8] sm:$0xff] }
  0x1b   :  { %1359 = vmatprep.subr.mxu1 %v1125_v42 }
  0x1c   :  { %1360 = vmatpush3.msra.mxu1 %v1125_v42 }
  0x1d   :  { %1361 = vmatprep.subr.mxu1 %v1124_v44 }
  0x1e   :  { %1362 = vmatpush3.msra.mxu1 %v1124_v44 }
  0x1f   :  { %1363 = vmatprep.subr.mxu1 %v1123_v46 }
  0x20   :  { %1364 = vmatpush3.msra.mxu1 %v1123_v46 }
  0x21   :  { %1365 = vmatprep.subr.mxu1 %v1122_v48 }
  0x22   :  { %1366 = vmatpush3.msra.mxu1 %v1122_v48  ;;  %v1153_v48 = vld [vmem:[%s2117_s3 + $0x160] sm:$0xff] }
  0x23   :  { %1367 = vmatprep.subr.mxu1 %v1121_v50 }
  0x24   :  { %1368 = vmatpush3.msra.mxu1 %v1121_v50  ;;  %v1169_v50 = vld [vmem:[%s2117_s3 + $0x1e0] sm:$0xff] }
  0x25   :  { %1413 = vmatprep.subr.mxu1 %v1765_v52 }
  0x7d   :  { %v40_v11 = vpop.permute.xlu1 %39  ;;  %v34_v12 = vpop.permute.xlu0 %33 }
  0x7e   :  { %vm44_vm1 = vcmp.eq.s32.totalorder %v1656_v10, %v34_v12  ;;  %vm46_vm2 = vcmp.eq.s32.totalorder %v1656_v10, %v40_v11  ;;  %v163_v11 = vld [vmem:[%s2118_s0 + $0x10] sm:$0xff]  ;;  %v312_v12 = vadd.s32 4294967295, %v218_v3 }
  0x7f   :  { %v1112_v14 = vsel %vm44_vm1, 1.0, %v1588_v13  ;;  %v1114_v17 = vsel %vm46_vm2, 1.0, %v1588_v13 }
  0x80   :  { %1331 = vmatprep.mubr.msk.f32.mxu0 %vm60_vm0, %v1112_v14  ;;  %vm316_vm12 = vcmp.ge.s32.totalorder %v312_v12, 0  ;;  %v1142_v12 = vld [vmem:[%s2117_s3 + $0x108] sm:$0xff] }
  0x81   :  { %v43_v15 = vpop.permute.xlu1 %42  ;;  %v37_v16 = vpop.permute.xlu0 %36 }
  0x82   :  { %vm45_vm3 = vcmp.eq.s32.totalorder %v1656_v10, %v37_v16  ;;  %vm47_vm4 = vcmp.eq.s32.totalorder %v1656_v10, %v43_v15  ;;  %v259_v16 = vadd.s32 4294967294, %v218_v3  ;;  %v1932_v3 = vadd.s32 8, %v1777_v59 }
  0x83   :  { %v1113_v18 = vsel %vm45_vm3, 1.0, %v1588_v13  ;;  %v1115_v19 = vsel %vm47_vm4, 1.0, %v1588_v13 }
  0x84   :  { %1332 = vmatmul.mubr.msk.f32.vlgmr.msra.gmra.mxu0 %vm60_vm0, %v1113_v18  ;;  %vm263_vm13 = vcmp.ge.s32.totalorder %v259_v16, 0  ;;  %v1158_v16 = vld [vmem:[%s2117_s3 + $0x188] sm:$0xff] }
  0x85   :  { %1334 = vmatprep.mubr.msk.f32.mxu0 %vm60_vm0, %v1114_v17  ;;  %1376 = vmatpush3.msra.mxu0 %v300_v21 }
  0x86   :  { %1377 = vmatprep.subr.mxu0 %v299_v23 }
  0x87   :  { %1378 = vmatpush3.msra.mxu0 %v299_v23 }
  0x88   :  { %1335 = vmatmul.mubr.msk.f32.gmra.mxu0 %vm60_vm0, %v1115_v19  ;;  %1379 = vmatprep.subr.mxu0 %v298_v25 }
  0x89   :  { %1380 = vmatpush3.msra.mxu0 %v298_v25 }
  0x8a   :  { %1381 = vmatprep.subr.mxu0 %v297_v27 }
  0x8b   :  { %1382 = vmatpush3.msra.mxu0 %v297_v27 }
  0x8c   :  { %1383 = vmatprep.subr.mxu0 %v296_v29 }
  0x8d   :  { %1384 = vmatpush3.msra.mxu0 %v296_v29 }
  0x8e   :  { %1385 = vmatprep.subr.mxu0 %v295_v31 }
  0x8f   :  { %1386 = vmatpush3.msra.mxu0 %v295_v31  ;;  %v1171_v31 = vld [vmem:[%s2117_s3 + $0x1f0] sm:$0xff] }
  0x90   :  { %1387 = vmatprep.subr.mxu0 %v294_v33 }
  0x91   :  { %1388 = vmatpush3.msra.mxu0 %v294_v33 }
  0x92   :  { %1389 = vmatprep.subr.mxu0 %v293_v35 }
  0x93   :  { %1390 = vmatpush3.msra.mxu0 %v293_v35 }
  0x94   :  { %1391 = vmatprep.subr.mxu0 %v292_v37 }
  0x95   :  { %1392 = vmatpush3.msra.mxu0 %v292_v37 }
  0x96   :  { %1393 = vmatprep.subr.mxu0 %v291_v39 }
  0x97   :  { %1394 = vmatpush3.msra.mxu0 %v291_v39  ;;  %v1154_v39 = vld [vmem:[%s2117_s3 + $0x168] sm:$0xff] }
  0x98   :  { %1395 = vmatprep.subr.mxu0 %v290_v41 }
  0x99   :  { %1396 = vmatpush3.msra.mxu0 %v290_v41 }
  0x9a   :  { %1397 = vmatprep.subr.mxu0 %v289_v43 }
  0x9b   :  { %1398 = vmatpush3.msra.mxu0 %v289_v43 }
  0x9c   :  { %1399 = vmatprep.subr.mxu0 %v288_v45 }
  0x9d   :  { %1400 = vmatpush3.msra.mxu0 %v288_v45 }
  0x9e   :  { %1401 = vmatprep.subr.mxu0 %v287_v47 }
  0x9f   :  { %1402 = vmatpush3.msra.mxu0 %v287_v47 }
  0xa0   :  { %1403 = vmatprep.subr.mxu0 %v286_v49 }
  0xa1   :  { %1404 = vmatpush3.msra.mxu0 %v286_v49 }
  0xa2   :  { %1405 = vmatprep.subr.mxu0 %v285_v51 }
  0xa3   :  { %1406 = vmatpush3.msra.mxu0 %v285_v51 }
  0xa4   :  { %1451 = vmatprep.subr.mxu0 %v1770_v53 }
 0x144   :  { %v1333_v54 = vpop.f32.mrf.mxu0 }
 0x146   :  { %v139_v55 = vpop.f32.mrf.mxu0 }
 0x147   :  { %169 = vrot.lane.b32.xlu0 %v139_v55, %s1589_s10  ;;  %v1167_v55 = vld [vmem:[%s2117_s3 + $0x1d0] sm:$0xff] }
 0x148   :  { %v1336_v56 = vpop.f32.mrf.mxu0 }
 0x149   :  { %175 = vrot.lane.b32.xlu1 %v1336_v56, %s1589_s10  ;;  %v1150_v56 = vld [vmem:[%s2117_s3 + $0x148] sm:$0xff] }
 0x14a   :  { %v149_v58 = vpop.f32.mrf.mxu0 }
 0x14b   :  { %171 = vrot.lane.b32.xlu0 %v1333_v54, %s1589_s10  ;;  %v1151_v54 = vld [vmem:[%s2117_s3 + $0x150] sm:$0xff] }
 0x14d   :  { %182 = vrot.lane.b32.xlu1 %v1120_v57, %s1590_s11  ;;  %v1166_v57 = vld [vmem:[%s2117_s3 + $0x1c8] sm:$0xff] }
 0x14f   :  { %173 = vrot.lane.b32.xlu0 %v149_v58, %s1589_s10  ;;  %v1149_v58 = vld [vmem:[%s2117_s3 + $0x140] sm:$0xff] }
 0x1b9   :  { %v170_v62 = vpop.permute.xlu0 %169 }
 0x1ba   :  { %v186_v8 = vsel %vm185_vm6, %v161_v4, %v170_v62  ;;  %v1164_v62 = vld [vmem:[%s2117_s3 + $0x1b8] sm:$0xff]  ;;  %v1145_v4 = vld [vmem:[%s2117_s3 + $0x120] sm:$0xff] }
 0x1bb   :  { %v176_v0 = vpop.permute.xlu1 %175 }
 0x1bc   :  { %v189_v9 = vsel %vm185_vm6, %v164_v5, %v176_v0  ;;  %v1163_v0 = vld [vmem:[%s2117_s3 + $0x1b0] sm:$0xff]  ;;  %v1161_v5 = vld [vmem:[%s2117_s3 + $0x1a0] sm:$0xff] }
 0x1bd   :  { %v172_v6 = vpop.permute.xlu0 %171 }
 0x1be   :  { %v187_v7 = vsel %vm185_vm6, %v162_v1, %v172_v6  ;;  %v1146_v1 = vld [vmem:[%s2117_s3 + $0x128] sm:$0xff]  ;;  %v1144_v6 = vld [vmem:[%s2117_s3 + $0x118] sm:$0xff] }
 0x1bf   :  { %v183_v10 = vpop.permute.xlu1 %182 }
 0x1c0   :  { %v1799_v13 = vsel %vm190_vm7, %v186_v8, %v183_v10  ;;  %v1802_v14 = vsel %vm190_vm7, %v187_v7, %v183_v10  ;;  %v1805_v15 = vsel %vm190_vm7, %v189_v9, %v183_v10  ;;  %v1160_v7 = vld [vmem:[%s2117_s3 + $0x198] sm:$0xff]  ;;  %v211_v8 = vand.u32 15, %v1932_v3 }
 0x1c1   :  { %v174_v17 = vpop.permute.xlu0 %173  ;;  %v301_v18 = vrot.slane %v1799_v13, 7  ;;  %v304_v19 = vrot.slane %v1805_v15, 7  ;;  %v248_v20 = vrot.slane %v1799_v13, 6  ;;  %v251_v21 = vrot.slane %v1805_v15, 6 }
 0x1c2   :  { %v188_v22 = vsel %vm185_vm6, %v163_v11, %v174_v17  ;;  %v302_v23 = vrot.slane %v1802_v14, 7  ;;  %v249_v24 = vrot.slane %v1802_v14, 6  ;;  %v798_v35 = vrot.slane %v1799_v13, 2  ;;  %v1159_v11 = vld [vmem:[%s2117_s3 + $0x190] sm:$0xff] }
 0x1c3   :  { %v1815_v25 = vsel %vm190_vm7, %v188_v22, %v183_v10  ;;  %v309_v26 = vsel %vm305_vm8, %v304_v19, %v301_v18  ;;  %v256_v27 = vsel %vm252_vm10, %v251_v21, %v248_v20  ;;  %v801_v36 = vrot.slane %v1805_v15, 2  ;;  %v1143_v10 = vld [vmem:[%s2117_s3 + $0x110] sm:$0xff] }
 0x1c4   :  { %1369 = vmatprep.mubr.msk.f32.mxu1 %vm314_vm9, %v309_v26  ;;  %1407 = vmatprep.mubr.msk.f32.mxu0 %vm261_vm11, %v256_v27  ;;  %v308_v28 = vsel %vm305_vm8, %v301_v18, %v302_v23  ;;  %v255_v29 = vsel %vm252_vm10, %v248_v20, %v249_v24  ;;  %v800_v32 = vrot.slane %v1815_v25, 2  ;;  %v303_v33 = vrot.slane %v1815_v25, 7  ;;  %v1141_v20 = vld [vmem:[%s2117_s3 + $0x100] sm:$0xff]  ;;  %v1189_v27 = vld [vmem:[%s2117_s3 + $0x270] sm:$0xff] }
 0x1c5   :  { %1370 = vmatmul.mubr.f32.vlgmr.msra.gmra.mxu1 %v308_v28  ;;  %1408 = vmatmul.mubr.f32.vlgmr.msra.gmra.mxu0 %v255_v29  ;;  %v250_v34 = vrot.slane %v1815_v25, 6  ;;  %v799_v41 = vrot.slane %v1802_v14, 2  ;;  %v655_v42 = vrot.slane %v1799_v13, 1  ;;  %v656_v43 = vrot.slane %v1802_v14, 1  ;;  %v1188_v29 = vld [vmem:[%s2117_s3 + $0x268] sm:$0xff] }
 0x1c6   :  { %1414 = vmatpush3.msra.mxu1 %v1765_v52  ;;  %1452 = vmatpush3.msra.mxu0 %v1770_v53  ;;  %v307_v37 = vsel %vm305_vm8, %v302_v23, %v303_v33  ;;  %v1863_v45 = vsel %vm802_vm14, %v800_v32, %v801_v36  ;;  %v306_v46 = vsel %vm305_vm8, %v303_v33, %v304_v19  ;;  %v1152_v52 = vld [vmem:[%s2117_s3 + $0x158] sm:$0xff]  ;;  %v1948_v9 = vadd.s32 24, %v1777_v59  ;;  %v1183_v59 = vld [vmem:[%s2117_s3 + $0x240] sm:$0xff]  ;;  %v1181_v33 = vld [vmem:[%s2117_s3 + $0x230] sm:$0xff] }
 0x1c7   :  { %1415 = vmatprep.subr.mxu1 %v1155_v30  ;;  %1453 = vmatprep.subr.mxu0 %v1171_v31  ;;  %v254_v38 = vsel %vm252_vm10, %v249_v24, %v250_v34  ;;  %v1859_v44 = vsel %vm802_vm14, %v799_v41, %v800_v32  ;;  %v253_v47 = vsel %vm252_vm10, %v250_v34, %v251_v21  ;;  %v1168_v53 = vld [vmem:[%s2117_s3 + $0x1d8] sm:$0xff]  ;;  %v665_v17 = vadd.s32 1, %v211_v8  ;;  %v1157_v21 = vld [vmem:[%s2117_s3 + $0x180] sm:$0xff]  ;;  %v1180_v34 = vld [vmem:[%s2117_s3 + $0x228] sm:$0xff] }
 0x1c8   :  { %1372 = vmatprep.mubr.msk.f32.mxu1 %vm316_vm12, %v307_v37  ;;  %1410 = vmatprep.mubr.msk.f32.mxu0 %vm263_vm13, %v254_v38  ;;  %v1877_v49 = vsel %vm802_vm14, %v801_v36, %v798_v35  ;;  %v662_v51 = vsel %vm659_vm15, %v655_v42, %v656_v43  ;;  %v225_v18 = vand.u32 15, %v1948_v9  ;;  %v657_v19 = vrot.slane %v1815_v25, 1  ;;  %v1190_v23 = vld [vmem:[%s2117_s3 + $0x278] sm:$0xff]  ;;  %v1177_v37 = vld [vmem:[%s2117_s3 + $0x210] sm:$0xff]  ;;  %v1176_v38 = vld [vmem:[%s2117_s3 + $0x208] sm:$0xff] }
 0x1c9   :  { %1416 = vmatpush3.msra.mxu1 %v1155_v30  ;;  %1454 = vmatpush3.msra.mxu0 %v1171_v31  ;;  %vm673_vm0 = vcmp.lt.s32.totalorder %v665_v17, 16  ;;  %v658_v26 = vrot.slane %v1805_v15, 1  ;;  %v805_v31 = vsel %vm802_vm14, %v798_v35, %v799_v41  ;;  %v1186_v32 = vld [vmem:[%s2117_s3 + $0x258] sm:$0xff]  ;;  %v1179_v35 = vld [vmem:[%s2117_s3 + $0x220] sm:$0xff] }
 0x1ca   :  { %1417 = vmatprep.subr.mxu1 %v1154_v39  ;;  %1455 = vmatprep.subr.mxu0 %v1170_v40  ;;  %v667_v22 = vadd.s32 1, %v225_v18  ;;  %v661_v24 = vsel %vm659_vm15, %v656_v43, %v657_v19  ;;  %v1178_v36 = vld [vmem:[%s2117_s3 + $0x218] sm:$0xff]  ;;  %v810_v41 = vadd.s32 2, %v225_v18  ;;  %v970_v43 = vld [vmem:[%s2119_s5 + $0x70] sm:$0xff] }
 0x1cb   :  { %1373 = vmatmul.mubr.f32.gmra.mxu1 %v306_v46  ;;  %1411 = vmatmul.mubr.f32.gmra.mxu0 %v253_v47  ;;  %v660_v28 = vsel %vm659_vm15, %v657_v19, %v658_v26  ;;  %v663_v30 = vsel %vm659_vm15, %v658_v26, %v655_v42  ;;  %v971_v42 = vld [vmem:[%s2119_s5 + $0x78] sm:$0xff]  ;;  %v969_v46 = vld [vmem:[%s2119_s5 + $0x68] sm:$0xff]  ;;  %v966_v47 = vld [vmem:[%s2119_s5 + $0x50] sm:$0xff] }
 0x1cc   :  { %1418 = vmatpush3.msra.mxu1 %v1154_v39  ;;  %1456 = vmatpush3.msra.mxu0 %v1170_v40  ;;  %vm675_vm1 = vcmp.lt.s32.totalorder %v667_v22, 16  ;;  %v808_v39 = vadd.s32 2, %v211_v8  ;;  %v1175_v40 = vld [vmem:[%s2117_s3 + $0x200] sm:$0xff]  ;;  %vm818_vm3 = vcmp.lt.s32.totalorder %v810_v41, 16 }
 0x1cd   :  { %1419 = vmatprep.subr.mxu1 %v1153_v48  ;;  %1445 = vmatprep.mubr.f32.mxu1 %v1799_v13  ;;  %v1184_v13 = vld [vmem:[%s2117_s3 + $0x248] sm:$0xff]  ;;  %v1193_v26 = vld [vmem:[%s2120_s4] ss:$0 sm:$0xff] }
 0x1ce   :  { %1457 = vmatprep.subr.mxu0 %v1169_v50  ;;  %1483 = vmatprep.mubr.f32.mxu0 %v662_v51  ;;  %vm816_vm2 = vcmp.lt.s32.totalorder %v808_v39, 16  ;;  %v962_v51 = vld [vmem:[%s2119_s5 + $0x30] sm:$0xff]  ;;  %v1194_v39 = vld [vmem:[%s2121_s6] ss:$0 sm:$0xff] }
 0x1cf   :  { %1420 = vmatpush3.msra.mxu1 %v1153_v48  ;;  %1458 = vmatpush3.msra.mxu0 %v1169_v50  ;;  %v965_v48 = vld [vmem:[%s2119_s5 + $0x48] sm:$0xff]  ;;  %v963_v50 = vld [vmem:[%s2119_s5 + $0x38] sm:$0xff] }
 0x1d0   :  { %1421 = vmatprep.subr.mxu1 %v1152_v52  ;;  %1459 = vmatprep.subr.mxu0 %v1168_v53 }
 0x1d1   :  { %1422 = vmatpush3.msra.mxu1 %v1152_v52  ;;  %1460 = vmatpush3.msra.mxu0 %v1168_v53  ;;  %v961_v52 = vld [vmem:[%s2119_s5 + $0x28] sm:$0xff]  ;;  %v960_v53 = vld [vmem:[%s2119_s5 + $0x20] sm:$0xff] }
 0x1d2   :  { %1423 = vmatprep.subr.mxu1 %v1151_v54  ;;  %1461 = vmatprep.subr.mxu0 %v1167_v55 }
 0x1d3   :  { %1424 = vmatpush3.msra.mxu1 %v1151_v54  ;;  %1462 = vmatpush3.msra.mxu0 %v1167_v55  ;;  %v959_v54 = vld [vmem:[%s2119_s5 + $0x18] sm:$0xff]  ;;  %v958_v55 = vld [vmem:[%s2119_s5 + $0x10] sm:$0xff] }
 0x1d4   :  { %1425 = vmatprep.subr.mxu1 %v1150_v56  ;;  %1463 = vmatprep.subr.mxu0 %v1166_v57 }
 0x1d5   :  { %1426 = vmatpush3.msra.mxu1 %v1150_v56  ;;  %1464 = vmatpush3.msra.mxu0 %v1166_v57  ;;  %v957_v56 = vld [vmem:[%s2119_s5 + $0x8] sm:$0xff]  ;;  %v956_v57 = vld [vmem:[%s2119_s5] sm:$0xff] }
 0x1d6   :  { %1427 = vmatprep.subr.mxu1 %v1149_v58  ;;  %1465 = vmatprep.subr.mxu0 %v1165_v60 }
 0x1d7   :  { %1428 = vmatpush3.msra.mxu1 %v1149_v58  ;;  %1466 = vmatpush3.msra.mxu0 %v1165_v60 }
 0x1d8   :  { %1429 = vmatprep.subr.mxu1 %v1148_v61  ;;  %1467 = vmatprep.subr.mxu0 %v1164_v62 }
 0x1d9   :  { %1430 = vmatpush3.msra.mxu1 %v1148_v61  ;;  %1468 = vmatpush3.msra.mxu0 %v1164_v62 }
 0x1da   :  { %1431 = vmatprep.subr.mxu1 %v1147_v63  ;;  %1469 = vmatprep.subr.mxu0 %v1163_v0 }
 0x1db   :  { %1432 = vmatpush3.msra.mxu1 %v1147_v63  ;;  %1470 = vmatpush3.msra.mxu0 %v1163_v0 }
 0x1dc   :  { %1433 = vmatprep.subr.mxu1 %v1146_v1  ;;  %1471 = vmatprep.subr.mxu0 %v1162_v2 }
 0x1dd   :  { %1434 = vmatpush3.msra.mxu1 %v1146_v1  ;;  %1472 = vmatpush3.msra.mxu0 %v1162_v2 }
 0x1de   :  { %1435 = vmatprep.subr.mxu1 %v1145_v4  ;;  %1473 = vmatprep.subr.mxu0 %v1161_v5 }
 0x1df   :  { %1436 = vmatpush3.msra.mxu1 %v1145_v4  ;;  %1474 = vmatpush3.msra.mxu0 %v1161_v5 }
 0x1e0   :  { %1437 = vmatprep.subr.mxu1 %v1144_v6  ;;  %1475 = vmatprep.subr.mxu0 %v1160_v7 }
 0x1e1   :  { %1438 = vmatpush3.msra.mxu1 %v1144_v6  ;;  %1476 = vmatpush3.msra.mxu0 %v1160_v7 }
 0x1e2   :  { %1439 = vmatprep.subr.mxu1 %v1143_v10  ;;  %1477 = vmatprep.subr.mxu0 %v1159_v11 }
 0x1e3   :  { %1440 = vmatpush3.msra.mxu1 %v1143_v10  ;;  %1478 = vmatpush3.msra.mxu0 %v1159_v11 }
 0x1e4   :  { %1441 = vmatprep.subr.mxu1 %v1142_v12  ;;  %1479 = vmatprep.subr.mxu0 %v1158_v16 }
 0x1e5   :  { %1442 = vmatpush3.msra.mxu1 %v1142_v12  ;;  %1480 = vmatpush3.msra.mxu0 %v1158_v16 }
 0x1e6   :  { %1443 = vmatprep.subr.mxu1 %v1141_v20  ;;  %1481 = vmatprep.subr.mxu0 %v1157_v21 }
 0x1e7   :  { %1444 = vmatpush3.msra.mxu1 %v1141_v20  ;;  %1482 = vmatpush3.msra.mxu0 %v1157_v21 }
 0x1e8   :  { %1446 = vmatmul.mubr.f32.vlgmr.msra.gmra.mxu1 %v1802_v14  ;;  %1484 = vmatmul.mubr.msk.f32.vlgmr.msra.gmra.mxu0 %vm673_vm0, %v661_v24  ;;  %v1182_v14 = vld [vmem:[%s2117_s3 + $0x238] sm:$0xff] }
 0x1e9   :  { %1489 = vmatprep.subr.mxu1 %v1190_v23  ;;  %1448 = vmatprep.mubr.f32.mxu1 %v1815_v25  ;;  %v1187_v25 = vld [vmem:[%s2117_s3 + $0x260] sm:$0xff] }
 0x1ea   :  { %1486 = vmatprep.mubr.f32.mxu0 %v660_v28  ;;  %1490 = vmatpush3.msra.mxu1 %v1190_v23 }
 0x1eb   :  { %1491 = vmatprep.subr.mxu1 %v1189_v27  ;;  %1527 = vmatprep.subr.mxu0 %v971_v42 }
 0x1ec   :  { %1492 = vmatpush3.msra.mxu1 %v1189_v27  ;;  %1487 = vmatmul.mubr.msk.f32.gmra.mxu0 %vm675_vm1, %v663_v30 }
 0x1ed   :  { %1449 = vmatmul.mubr.f32.gmra.mxu1 %v1805_v15  ;;  %1493 = vmatprep.subr.mxu1 %v1188_v29  ;;  %v1185_v15 = vld [vmem:[%s2117_s3 + $0x250] sm:$0xff] }
 0x1ee   :  { %1494 = vmatpush3.msra.mxu1 %v1188_v29  ;;  %1521 = vmatprep.mubr.f32.mxu1 %v805_v31 }
 0x1ef   :  { %1495 = vmatprep.subr.mxu1 %v1187_v25  ;;  %1528 = vmatpush3.msra.mxu0 %v971_v42 }
 0x1f0   :  { %1496 = vmatpush3.msra.mxu1 %v1187_v25  ;;  %1529 = vmatprep.subr.mxu0 %v970_v43 }
 0x1f1   :  { %1497 = vmatprep.subr.mxu1 %v1186_v32  ;;  %1530 = vmatpush3.msra.mxu0 %v970_v43 }
 0x1f2   :  { %1498 = vmatpush3.msra.mxu1 %v1186_v32  ;;  %1531 = vmatprep.subr.mxu0 %v969_v46 }
 0x1f3   :  { %1499 = vmatprep.subr.mxu1 %v1185_v15  ;;  %1532 = vmatpush3.msra.mxu0 %v969_v46 }
 0x1f4   :  { %1500 = vmatpush3.msra.mxu1 %v1185_v15 }
 0x1f5   :  { %1501 = vmatprep.subr.mxu1 %v1184_v13 }
 0x1f6   :  { %1502 = vmatpush3.msra.mxu1 %v1184_v13 }
 0x1f7   :  { %1503 = vmatprep.subr.mxu1 %v1183_v59 }
 0x1f8   :  { %1504 = vmatpush3.msra.mxu1 %v1183_v59 }
 0x1f9   :  { %1505 = vmatprep.subr.mxu1 %v1182_v14 }
 0x1fa   :  { %1506 = vmatpush3.msra.mxu1 %v1182_v14 }
 0x1fb   :  { %1507 = vmatprep.subr.mxu1 %v1181_v33 }
 0x1fc   :  { %1508 = vmatpush3.msra.mxu1 %v1181_v33 }
 0x1fd   :  { %1509 = vmatprep.subr.mxu1 %v1180_v34 }
 0x1fe   :  { %1510 = vmatpush3.msra.mxu1 %v1180_v34 }
 0x1ff   :  { %1511 = vmatprep.subr.mxu1 %v1179_v35 }
 0x200   :  { %1512 = vmatpush3.msra.mxu1 %v1179_v35 }
 0x201   :  { %1513 = vmatprep.subr.mxu1 %v1178_v36 }
 0x202   :  { %1514 = vmatpush3.msra.mxu1 %v1178_v36 }
 0x203   :  { %1515 = vmatprep.subr.mxu1 %v1177_v37 }
 0x204   :  { %1516 = vmatpush3.msra.mxu1 %v1177_v37 }
 0x205   :  { %1517 = vmatprep.subr.mxu1 %v1176_v38 }
 0x206   :  { %1518 = vmatpush3.msra.mxu1 %v1176_v38 }
 0x207   :  { %1519 = vmatprep.subr.mxu1 %v1175_v40 }
 0x208   :  { %1520 = vmatpush3.msra.mxu1 %v1175_v40 }
 0x209   :  { %1522 = vmatmul.mubr.msk.f32.vlgmr.msra.gmra.mxu1 %vm816_vm2, %v1859_v44  ;;  %v968_v44 = vld [vmem:[%s2119_s5 + $0x60] sm:$0xff] }
 0x20a   :  { %1524 = vmatprep.mubr.f32.mxu1 %v1863_v45  ;;  %v967_v45 = vld [vmem:[%s2119_s5 + $0x58] sm:$0xff]  ;;  %1533 = vmatprep.subr.mxu0 %v968_v44 }
 0x20b   :  { %1534 = vmatpush3.msra.mxu0 %v968_v44 }
 0x20c   :  { %1535 = vmatprep.subr.mxu0 %v967_v45 }
 0x20d   :  { %1525 = vmatmul.mubr.msk.f32.gmra.mxu1 %vm818_vm3, %v1877_v49  ;;  %1536 = vmatpush3.msra.mxu0 %v967_v45  ;;  %v964_v49 = vld [vmem:[%s2119_s5 + $0x40] sm:$0xff] }
 0x20e   :  { %1537 = vmatprep.subr.mxu0 %v966_v47 }
 0x20f   :  { %1538 = vmatpush3.msra.mxu0 %v966_v47 }
 0x210   :  { %1539 = vmatprep.subr.mxu0 %v965_v48 }
 0x211   :  { %1540 = vmatpush3.msra.mxu0 %v965_v48 }
 0x212   :  { %1541 = vmatprep.subr.mxu0 %v964_v49 }
 0x213   :  { %1542 = vmatpush3.msra.mxu0 %v964_v49 }
 0x214   :  { %1543 = vmatprep.subr.mxu0 %v963_v50 }
 0x215   :  { %1544 = vmatpush3.msra.mxu0 %v963_v50 }
 0x216   :  { %1545 = vmatprep.subr.mxu0 %v962_v51 }
 0x217   :  { %1546 = vmatpush3.msra.mxu0 %v962_v51 }
 0x218   :  { %1547 = vmatprep.subr.mxu0 %v961_v52 }
 0x219   :  { %1548 = vmatpush3.msra.mxu0 %v961_v52 }
 0x21a   :  { %1549 = vmatprep.subr.mxu0 %v960_v53 }
 0x21b   :  { %1550 = vmatpush3.msra.mxu0 %v960_v53 }
 0x21c   :  { %1551 = vmatprep.subr.mxu0 %v959_v54 }
 0x21d   :  { %1552 = vmatpush3.msra.mxu0 %v959_v54 }
 0x21e   :  { %1553 = vmatprep.subr.mxu0 %v958_v55 }
 0x21f   :  { %1554 = vmatpush3.msra.mxu0 %v958_v55 }
 0x220   :  { %1555 = vmatprep.subr.mxu0 %v957_v56 }
 0x221   :  { %1556 = vmatpush3.msra.mxu0 %v957_v56 }
 0x222   :  { %1557 = vmatprep.subr.mxu0 %v956_v57 }
 0x223   :  { %1558 = vmatpush3.msra.mxu0 %v956_v57 }
 0x285   :  { %v1371_v58 = vpop.f32.mrf.mxu1  ;;  %v1409_v61 = vpop.f32.mrf.mxu0 }
 0x286   :  { %v512_v6 = vadd.f32 %v1409_v61, %v1371_v58 }
 0x287   :  { %v421_v60 = vpop.f32.mrf.mxu1  ;;  %v506_v63 = vpop.f32.mrf.mxu0 }
 0x288   :  { %v507_v8 = vadd.f32 %v506_v63, %v421_v60 }
 0x28b   :  { %v1374_v62 = vpop.f32.mrf.mxu1  ;;  %v1412_v1 = vpop.f32.mrf.mxu0 }
 0x28c   :  { %v522_v11 = vadd.f32 %v1412_v1, %v1374_v62 }
 0x28d   :  { %v431_v0 = vpop.f32.mrf.mxu1  ;;  %v516_v3 = vpop.f32.mrf.mxu0 }
 0x28e   :  { %v517_v17 = vadd.f32 %v516_v3, %v431_v0 }
 0x2a8   :  { %v1447_v2 = vpop.f32.mrf.mxu1  ;;  %v1485_v5 = vpop.f32.mrf.mxu0 }
 0x2a9   :  { %v652_v9 = vadd.f32 %v1447_v2, %v512_v6 }
 0x2aa   :  { %v632_v4 = vpop.f32.mrf.mxu1  ;;  %v775_v10 = vpop.f32.mrf.mxu0 }
 0x2ab   :  { %v651_v12 = vadd.f32 %v632_v4, %v507_v8  ;;  %v795_v18 = vadd.f32 %v1485_v5, %v652_v9 }
 0x2ac   :  { %v1488_v20 = vpop.f32.mrf.mxu0 }
 0x2ad   :  { %v1450_v7 = vpop.f32.mrf.mxu1  ;;  %v794_v22 = vadd.f32 %v775_v10, %v651_v12 }
 0x2ae   :  { %v654_v19 = vadd.f32 %v1450_v7, %v522_v11  ;;  %v785_v30 = vpop.f32.mrf.mxu0 }
 0x2af   :  { %v642_v16 = vpop.f32.mrf.mxu1 }
 0x2b0   :  { %v653_v23 = vadd.f32 %v642_v16, %v517_v17  ;;  %v797_v28 = vadd.f32 %v1488_v20, %v654_v19 }
 0x2b2   :  { %v796_v32 = vadd.f32 %v785_v30, %v653_v23 }
 0x2c9   :  { %v1523_v21 = vpop.f32.mrf.mxu1 }
 0x2ca   :  { %v938_v24 = vadd.f32 %v1523_v21, %v795_v18 }
 0x2cb   :  { %v918_v27 = vpop.f32.mrf.mxu1 }
 0x2cc   :  { %v937_v29 = vadd.f32 %v918_v27, %v794_v22  ;;  %v949_v25 = vadd.f32 %v1193_v26, %v938_v24 }
 0x2cd   :  { %v1526_v31 = vpop.f32.mrf.mxu1 }
 0x2ce   :  { %v948_v15 = vadd.f32 %v1193_v26, %v937_v29  ;;  %v940_v13 = vadd.f32 %v1526_v31, %v797_v28  ;;  %v953_v34 = vmax.f32 %v949_v25, 0.0 }
 0x2cf   :  { %v928_v59 = vpop.f32.mrf.mxu1 }
 0x2d0   :  { %v952_v14 = vmax.f32 %v948_v15, 0.0  ;;  %v939_v33 = vadd.f32 %v928_v59, %v796_v32  ;;  %v951_v35 = vadd.f32 %v1193_v26, %v940_v13 }
 0x2d2   :  { %v950_v36 = vadd.f32 %v1193_v26, %v939_v33  ;;  %1559 = vmatprep.mubr.f32.mxu0 %v952_v14  ;;  %v955_v38 = vmax.f32 %v951_v35, 0.0 }
 0x2d3   :  { %1560 = vmatmul.mubr.f32.vlgmr.msra.gmra.mxu0 %v953_v34 }
 0x2d4   :  { %v954_v37 = vmax.f32 %v950_v36, 0.0 }
 0x2d6   :  { %1562 = vmatprep.mubr.f32.mxu0 %v954_v37 }
 0x2d7   :  { %1563 = vmatmul.mubr.f32.gmra.mxu0 %v955_v38 }
 0x393   :  { %v1561_v40 = vpop.f32.mrf.mxu0 }
 0x394   :  { %v1051_v41 = vadd.f32 %v1561_v40, %v1194_v39 }
 0x395   :  { %v1045_v42 = vpop.f32.mrf.mxu0 }
 0x396   :  { %v1046_v43 = vadd.f32 %v1194_v39, %v1045_v42  ;;  %1066 = vmax.xlane.f32.xlu0 %v1051_v41 }
 0x397   :  { %v1564_v46 = vpop.f32.mrf.mxu0 }
 0x398   :  { %1064 = vmax.xlane.f32.xlu1 %v1046_v43  ;;  %v1061_v45 = vadd.f32 %v1564_v46, %v1194_v39 }
 0x399   :  { %v1055_v44 = vpop.f32.mrf.mxu0 }
 0x39a   :  { %v1056_v47 = vadd.f32 %v1194_v39, %v1055_v44 }
 0x39c   :  { %1068 = vmax.xlane.f32.xlu0 %v1056_v47  ;;  %1070 = vmax.xlane.f32.xlu1 %v1061_v45 }
 0x41f   :  { %v1067_v48 = vpop.xlane.xlu0 %1066 }
 0x420   :  { %v1073_v49 = vsub.f32 %v1051_v41, %v1067_v48 }
 0x421   :  { %v1065_v50 = vpop.xlane.xlu1 %1064 }
 0x422   :  { %v1078_v51 = vmul.f32 1.442695, %v1073_v49  ;;  %v1072_v52 = vsub.f32 %v1046_v43, %v1065_v50 }
 0x424   :  { %1571 = vpow2.f32 %v1078_v51  ;;  %v1076_v53 = vmul.f32 1.442695, %v1072_v52 }
 0x425   :  { %v1069_v54 = vpop.xlane.xlu0 %1068  ;;  %v1071_v55 = vpop.xlane.xlu1 %1070 }
 0x426   :  { %1573 = vpow2.f32 %v1076_v53  ;;  %v1074_v56 = vsub.f32 %v1056_v47, %v1069_v54  ;;  %v1075_v57 = vsub.f32 %v1061_v45, %v1071_v55 }
 0x428   :  { %v1080_v58 = vmul.f32 1.442695, %v1074_v56  ;;  %v1082_v60 = vmul.f32 1.442695, %v1075_v57 }
 0x42a   :  { %1575 = vpow2.f32 %v1080_v58 }
 0x42b   :  { %1577 = vpow2.f32 %v1082_v60 }
 0x431   :  { %v1572_v61 = vpop.eup %1571 }
 0x432   :  { %1086 = vadd.xlane.f32.xlu1 %v1572_v61 }
 0x433   :  { %v1574_v62 = vpop.eup %1573 }
 0x434   :  { %1084 = vadd.xlane.f32.xlu0 %v1574_v62 }
 0x437   :  { %v1576_v63 = vpop.eup %1575 }
 0x438   :  { %v1578_v0 = vpop.eup %1577  ;;  %1088 = vadd.xlane.f32.xlu0 %v1576_v63 }
 0x439   :  { %1090 = vadd.xlane.f32.xlu1 %v1578_v0 }
 0x4bb   :  { %v1087_v1 = vpop.xlane.xlu1 %1086 }
 0x4bc   :  { %1579 = vlog2.f32 %v1087_v1 }
 0x4bd   :  { %v1085_v2 = vpop.xlane.xlu0 %1084 }
 0x4be   :  { %1581 = vlog2.f32 %v1085_v2 }
 0x4c1   :  { %v1089_v3 = vpop.xlane.xlu0 %1088 }
 0x4c2   :  { %1583 = vlog2.f32 %v1089_v3  ;;  %v1091_v4 = vpop.xlane.xlu1 %1090 }
 0x4c3   :  { %1585 = vlog2.f32 %v1091_v4 }
 0x4c9   :  { %v1580_v5 = vpop.eup %1579 }
 0x4ca   :  { %v1095_v6 = vmul.f32 0.6931472, %v1580_v5 }
 0x4cb   :  { %v1582_v7 = vpop.eup %1581 }
 0x4cc   :  { %v1101_v8 = vsub.f32 %v1073_v49, %v1095_v6  ;;  %v1093_v9 = vmul.f32 0.6931472, %v1582_v7 }
 0x4ce   :  { %1105 = vst [vmem:[%s2122_s7 + $0x8] sm:$0xff] %v1101_v8  ;;  %v1100_v10 = vsub.f32 %v1072_v52, %v1093_v9 }
 0x4cf   :  { %v1584_v11 = vpop.eup %1583 }
 0x4d0   :  { %v1586_v12 = vpop.eup %1585  ;;  %1104 = vst [vmem:[%s2122_s7] sm:$0xff] %v1100_v10  ;;  %v1097_v16 = vmul.f32 0.6931472, %v1584_v11 }
 0x4d1   :  { %v1099_v17 = vmul.f32 0.6931472, %v1586_v12 }
 0x4d2   :  { %v1102_v18 = vsub.f32 %v1074_v56, %v1097_v16 }
 0x4d3   :  { %v1103_v19 = vsub.f32 %v1075_v57, %v1099_v17 }
 0x4d4   :  { %1106 = vst [vmem:[%s2122_s7 + $0x10] sm:$0xff] %v1102_v18 }
 0x4d5   :  { %1107 = vst [vmem:[%s2122_s7 + $0x18] sm:$0xff] %v1103_v19 }

</bundles_post_ra>
